<compile_context>
chip_gen: v7x
topology: tpu7x:2x2x1
jax: 0.10.0
libtpu: 0.0.40
codegen_flags: <defaults>
</compile_context>

<pallas_src>
import jax
import jax.numpy as jnp
from jax.experimental import pallas as pl
from jax.experimental.pallas import tpu as pltpu


def _mlp_kernel(x_ref,
                w1_ref, b1_ref,
                w2_ref, b2_ref,
                w3_ref, b3_ref,
                w4_ref, b4_ref,
                o_ref):
    bf16 = jnp.bfloat16
    # Layer 1: Linear(input_dim, 256) + ReLU  (bf16 operands, f32 accumulation)
    h = jnp.dot(x_ref[...], w1_ref[...], preferred_element_type=jnp.float32)
    h = jnp.maximum(h + b1_ref[...], 0.0)
    # Layer 2: Linear(256, 128) + ReLU
    h = jnp.dot(h.astype(bf16), w2_ref[...], preferred_element_type=jnp.float32)
    h = jnp.maximum(h + b2_ref[...], 0.0)
    # Layer 3: Linear(128, 64) + ReLU
    h = jnp.dot(h.astype(bf16), w3_ref[...], preferred_element_type=jnp.float32)
    h = jnp.maximum(h + b3_ref[...], 0.0)
    # Layer 4: Linear(64, 1) + sigmoid.  Contract w4_row (1, 64) against h's
    # feature axis (q @ k^T style) so the tile result is a lane-dense (1, tm)
    # row -- avoids masked (tm, 1) partial stores and any sublane->lane
    # relayout.  Element-wise math stays f32.
    z = jax.lax.dot_general(
        w4_ref[...], h.astype(bf16),
        dimension_numbers=(((1,), (1,)), ((), ())),
        preferred_element_type=jnp.float32)                  # (1, tm)
    o_ref[...] = jax.nn.sigmoid(z + b4_ref[...]).astype(o_ref.dtype)


def _round_up(a, m):
    return (a + m - 1) // m * m


def _pick_tile(batch, tm):
    """Choose the batch tile (rows per grid step)."""
    b16 = _round_up(batch, 16)          # bf16 sublane packing is (16, 128)
    if b16 < 512:
        # Small batch: one tile covering the whole (padded) batch; block ==
        # full array dims, so any 16-aligned size is legal.
        return b16
    # Large batch: tile is a multiple of 256 (fills the 256-wide v6e/v7x MXU,
    # keeps the lane-dense output block a multiple of 128) and is capped at
    # half the batch so the grid has >=2 parallel steps (both v7x TCs).
    tm = max(256, (tm // 256) * 256)
    half = max(256, ((b16 // 2) // 256) * 256)
    return min(tm, half)


def logistic_regression_forward(x, params, *, tm=512):
    """x: (B, input_dim) float32. params: dict of (in,out) weights + (1,out) biases."""
    B, D = x.shape
    f32, bf16 = jnp.float32, jnp.bfloat16

    tile = _pick_tile(B, tm)
    B_pad = _round_up(B, tile)
    grid = B_pad // tile

    if B_pad != B:
        x = jnp.pad(x, ((0, B_pad - B), (0, 0)))

    # bf16 only for MXU operands; biases (VPU path) stay f32.
    x_bf = x.astype(bf16)
    w1, b1 = params["w1"].astype(bf16), params["b1"].astype(f32)
    w2, b2 = params["w2"].astype(bf16), params["b2"].astype(f32)
    w3, b3 = params["w3"].astype(bf16), params["b3"].astype(f32)
    w4 = params["w4"].reshape(1, -1).astype(bf16)   # (1, 64) row vector
    b4 = params["b4"].reshape(1, 1).astype(f32)     # (1, 1)

    full = lambda a: pl.BlockSpec(a.shape, lambda i: (0, 0))

    out_row = pl.pallas_call(
        _mlp_kernel,
        out_shape=jax.ShapeDtypeStruct((1, B_pad), f32),
        grid_spec=pltpu.PrefetchScalarGridSpec(
            num_scalar_prefetch=0,
            grid=(grid,),
            in_specs=[
                pl.BlockSpec((tile, D), lambda i: (i, 0)),   # x batch tile
                full(w1), full(b1),
                full(w2), full(b2),
                full(w3), full(b3),
                full(w4), full(b4),
            ],
            # Lane-dense output: each grid step writes one (1, tile) row chunk.
            out_specs=pl.BlockSpec((1, tile), lambda i: (0, i)),
        ),
        compiler_params=pltpu.CompilerParams(
            dimension_semantics=("parallel",)),
    )(x_bf, w1, b1, w2, b2, w3, b3, w4, b4)

    return out_row.reshape(B_pad, 1)[:B]


def init_params(key, input_dim):
    """Deterministic Kaiming-uniform-ish init matching nn.Linear shapes."""
    dims = [(input_dim, 256), (256, 128), (128, 64), (64, 1)]
    params = {}
    for idx, (fan_in, fan_out) in enumerate(dims, start=1):
        key, kw, kb = jax.random.split(key, 3)
        bound = 1.0 / jnp.sqrt(fan_in)
        params[f"w{idx}"] = jax.random.uniform(
            kw, (fan_in, fan_out), jnp.float32, -bound, bound)
        params[f"b{idx}"] = jax.random.uniform(
            kb, (1, fan_out), jnp.float32, -bound, bound)
    return params


if __name__ == "__main__":
    input_dim = 32
    batch = 8

    key = jax.random.PRNGKey(0)
    kx, kp = jax.random.split(key)
    x = jax.random.normal(kx, (batch, input_dim), jnp.float32)
    params = init_params(kp, input_dim)

    out = logistic_regression_forward(x, params)
    out = jax.block_until_ready(out)

    # Pure-JAX f32 reference check (kernel uses bf16 matmul operands with f32
    # accumulation, so allow a few 1e-3 of slack on the sigmoid output).
    h = x
    for i in range(1, 4):
        h = jnp.maximum(h @ params[f"w{i}"] + params[f"b{i}"], 0.0)
    ref = jax.nn.sigmoid(h @ params["w4"] + params["b4"])
    assert out.shape == (batch, 1)
    assert jnp.allclose(out, ref, atol=2e-2), "mismatch vs reference"

    print("KERNEL_OK")
</pallas_src>

<mosaic_0001>
module attributes {stable_mosaic.version = 11 : i64} {
  func.func @_mlp_kernel(%arg0: i32, %arg1: memref<16x32xbf16, #tpu.memory_space<vmem>>, %arg2: memref<32x256xbf16, #tpu.memory_space<vmem>>, %arg3: memref<1x256xf32, #tpu.memory_space<vmem>>, %arg4: memref<256x128xbf16, #tpu.memory_space<vmem>>, %arg5: memref<1x128xf32, #tpu.memory_space<vmem>>, %arg6: memref<128x64xbf16, #tpu.memory_space<vmem>>, %arg7: memref<1x64xf32, #tpu.memory_space<vmem>>, %arg8: memref<1x64xbf16, #tpu.memory_space<vmem>>, %arg9: memref<1x1xf32, #tpu.memory_space<vmem>>, %arg10: memref<1x16xf32, #tpu.memory_space<vmem>>) attributes {dimension_semantics = [#tpu.dimension_semantics<parallel>], iteration_bounds = array<i64: 1>, scalar_prefetch = 0 : i64, scratch_operands = 0 : i64, tpu.core_type = #tpu.core_type<tc>, window_params = [{transform_indices = @transform_0, window_bounds = array<i64: 16, 32>}, {pipeline_mode = #tpu.pipeline_mode<synchronous>, transform_indices = @transform_1, window_bounds = array<i64: 32, 256>}, {pipeline_mode = #tpu.pipeline_mode<synchronous>, transform_indices = @transform_2, window_bounds = array<i64: 1, 256>}, {pipeline_mode = #tpu.pipeline_mode<synchronous>, transform_indices = @transform_3, window_bounds = array<i64: 256, 128>}, {pipeline_mode = #tpu.pipeline_mode<synchronous>, transform_indices = @transform_4, window_bounds = array<i64: 1, 128>}, {pipeline_mode = #tpu.pipeline_mode<synchronous>, transform_indices = @transform_5, window_bounds = array<i64: 128, 64>}, {pipeline_mode = #tpu.pipeline_mode<synchronous>, transform_indices = @transform_6, window_bounds = array<i64: 1, 64>}, {pipeline_mode = #tpu.pipeline_mode<synchronous>, transform_indices = @transform_7, window_bounds = array<i64: 1, 64>}, {pipeline_mode = #tpu.pipeline_mode<synchronous>, transform_indices = @transform_8, window_bounds = array<i64: 1, 1>}, {transform_indices = @transform_9, window_bounds = array<i64: 1, 16>}]} {
    %c0 = arith.constant 0 : index
    %c0_0 = arith.constant 0 : index
    %0 = vector.load %arg1[%c0, %c0_0] : memref<16x32xbf16, #tpu.memory_space<vmem>>, vector<16x32xbf16>
    %c0_1 = arith.constant 0 : index
    %c0_2 = arith.constant 0 : index
    %1 = vector.load %arg2[%c0_1, %c0_2] : memref<32x256xbf16, #tpu.memory_space<vmem>>, vector<32x256xbf16>
    %cst = arith.constant dense<0.000000e+00> : vector<16x256xf32>
    %2 = tpu.matmul %0, %1, %cst {dimension_numbers = #tpu.dot_dimension_numbers<[1], [0], [0], [1], [0, 0, 1, 1], [], []>} : vector<16x32xbf16>, vector<32x256xbf16>, vector<16x256xf32> -> vector<16x256xf32>
    %c0_3 = arith.constant 0 : index
    %c0_4 = arith.constant 0 : index
    %3 = vector.load %arg3[%c0_3, %c0_4] : memref<1x256xf32, #tpu.memory_space<vmem>>, vector<1x256xf32>
    %4 = vector.broadcast %3 : vector<1x256xf32> to vector<16x256xf32>
    %5 = arith.addf %2, %4 : vector<16x256xf32>
    %cst_5 = arith.constant 0.000000e+00 : f32
    %6 = vector.broadcast %cst_5 : f32 to vector<16x256xf32>
    %7 = arith.maximumf %5, %6 : vector<16x256xf32>
    %8 = arith.truncf %7 : vector<16x256xf32> to vector<16x256xbf16>
    %c0_6 = arith.constant 0 : index
    %c0_7 = arith.constant 0 : index
    %9 = vector.load %arg4[%c0_6, %c0_7] : memref<256x128xbf16, #tpu.memory_space<vmem>>, vector<256x128xbf16>
    %cst_8 = arith.constant dense<0.000000e+00> : vector<16x128xf32>
    %10 = tpu.matmul %8, %9, %cst_8 {dimension_numbers = #tpu.dot_dimension_numbers<[1], [0], [0], [1], [0, 0, 1, 1], [], []>} : vector<16x256xbf16>, vector<256x128xbf16>, vector<16x128xf32> -> vector<16x128xf32>
    %c0_9 = arith.constant 0 : index
    %c0_10 = arith.constant 0 : index
    %11 = vector.load %arg5[%c0_9, %c0_10] : memref<1x128xf32, #tpu.memory_space<vmem>>, vector<1x128xf32>
    %12 = vector.broadcast %11 : vector<1x128xf32> to vector<16x128xf32>
    %13 = arith.addf %10, %12 : vector<16x128xf32>
    %cst_11 = arith.constant 0.000000e+00 : f32
    %14 = vector.broadcast %cst_11 : f32 to vector<16x128xf32>
    %15 = arith.maximumf %13, %14 : vector<16x128xf32>
    %16 = arith.truncf %15 : vector<16x128xf32> to vector<16x128xbf16>
    %c0_12 = arith.constant 0 : index
    %c0_13 = arith.constant 0 : index
    %17 = vector.load %arg6[%c0_12, %c0_13] : memref<128x64xbf16, #tpu.memory_space<vmem>>, vector<128x64xbf16>
    %cst_14 = arith.constant dense<0.000000e+00> : vector<16x64xf32>
    %18 = tpu.matmul %16, %17, %cst_14 {dimension_numbers = #tpu.dot_dimension_numbers<[1], [0], [0], [1], [0, 0, 1, 1], [], []>} : vector<16x128xbf16>, vector<128x64xbf16>, vector<16x64xf32> -> vector<16x64xf32>
    %c0_15 = arith.constant 0 : index
    %c0_16 = arith.constant 0 : index
    %19 = vector.load %arg7[%c0_15, %c0_16] : memref<1x64xf32, #tpu.memory_space<vmem>>, vector<1x64xf32>
    %20 = vector.broadcast %19 : vector<1x64xf32> to vector<16x64xf32>
    %21 = arith.addf %18, %20 : vector<16x64xf32>
    %cst_17 = arith.constant 0.000000e+00 : f32
    %22 = vector.broadcast %cst_17 : f32 to vector<16x64xf32>
    %23 = arith.maximumf %21, %22 : vector<16x64xf32>
    %c0_18 = arith.constant 0 : index
    %c0_19 = arith.constant 0 : index
    %24 = vector.load %arg8[%c0_18, %c0_19] : memref<1x64xbf16, #tpu.memory_space<vmem>>, vector<1x64xbf16>
    %25 = arith.truncf %23 : vector<16x64xf32> to vector<16x64xbf16>
    %cst_20 = arith.constant dense<0.000000e+00> : vector<1x16xf32>
    %26 = tpu.matmul %24, %25, %cst_20 {dimension_numbers = #tpu.dot_dimension_numbers<[1], [1], [0], [0], [0, 0, 1, 0], [], []>} : vector<1x64xbf16>, vector<16x64xbf16>, vector<1x16xf32> -> vector<1x16xf32>
    %c0_21 = arith.constant 0 : index
    %c0_22 = arith.constant 0 : index
    %27 = vector.load %arg9[%c0_21, %c0_22] : memref<1x1xf32, #tpu.memory_space<vmem>>, vector<1x1xf32>
    %28 = vector.broadcast %27 : vector<1x1xf32> to vector<1x16xf32>
    %29 = arith.addf %26, %28 : vector<1x16xf32>
    %30 = arith.negf %29 : vector<1x16xf32>
    %31 = math.exp %30 : vector<1x16xf32>
    %cst_23 = arith.constant 1.000000e+00 : f32
    %32 = vector.broadcast %cst_23 : f32 to vector<1x16xf32>
    %33 = arith.addf %32, %31 : vector<1x16xf32>
    %34 = arith.divf %32, %33 : vector<1x16xf32>
    %c0_24 = arith.constant 0 : index
    %c0_25 = arith.constant 0 : index
    %35 = vector.load %arg10[%c0_24, %c0_25] : memref<1x16xf32, #tpu.memory_space<vmem>>, vector<1x16xf32>
    tpu.vector_store %arg10[%c0_24, %c0_25], %34 {strides = array<i32>} : memref<1x16xf32, #tpu.memory_space<vmem>>, vector<1x16xf32>,
    return
  }
  func.func @transform_0(%arg0: i32) -> (i32, i32) {
    %c0_i32 = arith.constant 0 : i32
    %c0_i32_0 = arith.constant 0 : i32
    return %arg0, %c0_i32 : i32, i32
  }
  func.func @transform_1(%arg0: i32) -> (i32, i32) {
    %c0_i32 = arith.constant 0 : i32
    %c0_i32_0 = arith.constant 0 : i32
    %c0_i32_1 = arith.constant 0 : i32
    return %c0_i32, %c0_i32_0 : i32, i32
  }
  func.func @transform_2(%arg0: i32) -> (i32, i32) {
    %c0_i32 = arith.constant 0 : i32
    %c0_i32_0 = arith.constant 0 : i32
    %c0_i32_1 = arith.constant 0 : i32
    return %c0_i32, %c0_i32_0 : i32, i32
  }
  func.func @transform_3(%arg0: i32) -> (i32, i32) {
    %c0_i32 = arith.constant 0 : i32
    %c0_i32_0 = arith.constant 0 : i32
    %c0_i32_1 = arith.constant 0 : i32
    return %c0_i32, %c0_i32_0 : i32, i32
  }
  func.func @transform_4(%arg0: i32) -> (i32, i32) {
    %c0_i32 = arith.constant 0 : i32
    %c0_i32_0 = arith.constant 0 : i32
    %c0_i32_1 = arith.constant 0 : i32
    return %c0_i32, %c0_i32_0 : i32, i32
  }
  func.func @transform_5(%arg0: i32) -> (i32, i32) {
    %c0_i32 = arith.constant 0 : i32
    %c0_i32_0 = arith.constant 0 : i32
    %c0_i32_1 = arith.constant 0 : i32
    return %c0_i32, %c0_i32_0 : i32, i32
  }
  func.func @transform_6(%arg0: i32) -> (i32, i32) {
    %c0_i32 = arith.constant 0 : i32
    %c0_i32_0 = arith.constant 0 : i32
    %c0_i32_1 = arith.constant 0 : i32
    return %c0_i32, %c0_i32_0 : i32, i32
  }
  func.func @transform_7(%arg0: i32) -> (i32, i32) {
    %c0_i32 = arith.constant 0 : i32
    %c0_i32_0 = arith.constant 0 : i32
    %c0_i32_1 = arith.constant 0 : i32
    return %c0_i32, %c0_i32_0 : i32, i32
  }
  func.func @transform_8(%arg0: i32) -> (i32, i32) {
    %c0_i32 = arith.constant 0 : i32
    %c0_i32_0 = arith.constant 0 : i32
    %c0_i32_1 = arith.constant 0 : i32
    return %c0_i32, %c0_i32_0 : i32, i32
  }
  func.func @transform_9(%arg0: i32) -> (i32, i32) {
    %c0_i32 = arith.constant 0 : i32
    %c0_i32_0 = arith.constant 0 : i32
    return %c0_i32, %arg0 : i32, i32
  }
}

</mosaic_0001>

<bundles_post_ra>
// kernel: tpu_custom_call.1
= control target key start
LH: loop header
LB: loop body
LE: loop exit
PB: predicated region body
PF: predicated region fallthrough
CT: control target
= control target key end

     0   :  { %s848_s0 = inlined_call_operand.vmem [shape: bf16[16,32], index: 0, kind: input, shape index: {}]   ;;  %s849_s1 = inlined_call_operand.vmem [shape: bf16[32,256], index: 1, kind: input, shape index: {}]   ;;  %s850_s2 = inlined_call_operand.vmem [shape: f32[1,256], index: 2, kind: input, shape index: {}]   ;;  %s851_s3 = inlined_call_operand.hbm [shape: bf16[256,128], index: 3, kind: input, shape index: {}]   ;;  %s852_s4 = inlined_call_operand.vmem [shape: f32[1,128], index: 4, kind: input, shape index: {}]   ;;  %s853_s5 = inlined_call_operand.vmem [shape: bf16[128,64], index: 5, kind: input, shape index: {}]   ;;  %s854_s6 = inlined_call_operand.vmem [shape: f32[1,64], index: 6, kind: input, shape index: {}]   ;;  %s855_s7 = inlined_call_operand.vmem [shape: bf16[1,64], index: 7, kind: input, shape index: {}]   ;;  %s856_s8 = inlined_call_operand.<no memory space> [shape: f32[1,1], index: 8, kind: input, shape index: {}]   ;;  %s857_s9 = inlined_call_operand.hbm [shape: f32[1,16], index: 9, kind: output, shape index: {}]  }
   0x1   :  { %v14_v0 = vstv %s856_s8 }
   0x2   :  { %15 = vst [vmem:[#allocation2] sm:$0x1] %v14_v0 }
   0x3   :  { %16 = vsyncpa [#allocation4], 0 }
   0x4   :  { %17 = vsyncpa [#allocation5], 0  ;;  %s705_s11 = smov [#allocation3]   ;;  %s657_s15 = scalar_lea.hbm %s851_s3, 2048 }
   0x5   :  { %s29_s12 = sshll.u32 %s705_s11, 4  ;;  %p658_p0 = scmp.ne.s32.totalorder %s851_s3, %s657_s15  ;;  %s30_s12 = int_to_ptr.vmem [resolvable:$true] %s29_s12 }
   0x6   :  { %p661_p1 = scmp.lt.u32.totalorder %s657_s15, %s851_s3 }
   0x8   :  { %p663_p2 = pnand %p661_p1, %p658_p0 }
   0xa   :  { %666 = shalt.err (!%p663_p2)
}
   0xb   :  { %s667_s8 = scalar_lea.vmem %s30_s12, 2048  ;;  %p672_p4 = scmp.lt.s32.totalorder %s30_s12, %s30_s12 }
   0xc   :  { %p668_p3 = scmp.ne.s32.totalorder %s30_s12, %s667_s8  ;;  %p673_p5 = scmp.lt.s32.totalorder %s667_s8, %s667_s8 }
   0xe   :  { %p674_p6 = por %p673_p5, %p672_p4 }
  0x10   :  { %p675_p7 = pnand %p674_p6, %p668_p3 }
  0x12   :  { %678 = shalt.err (!%p675_p7)
}
  0x13   :  { %s706_s20 = smov 64   ;;  %s707_s21 = smov 4  }
  0x14   :  { %35 = dma.hbm_to_vmem [thread:$0]  %s851_s3, 2048, %s30_s12, [#allocation4], %s706_s20, %s706_s20, %s707_s21  }
  0x15   :  { %701 = dma.done.wait [#allocation4], 2048  }
  0x16   :  { %702 = vsyncadd [#allocation4], 4294965248  ;;  %v708_v1 = vmov 0   ;;  %v622_v2 = vld [vmem:[%s849_s1 + $0x4] ss:$8 sps:$4 sm:$0xff]   ;;  %vm93_vm0 = vcmask 261120   ;;  %v58_v29 = vlaneseq }
  0x17   :  { %129 = vmatprep.mubr.bf16.mxu0 %v708_v1  ;;  %621 = vset.pattern.permute.xlu0 %v708_v1  ;;  %v624_v3 = vld [vmem:[%s849_s1] ss:$8 sps:$4 sm:$0xff]   ;;  %v625_v4 = vld [vmem:[%s849_s1 + $0x14] ss:$8 sps:$4 sm:$0xff]   ;;  %v627_v5 = vld [vmem:[%s849_s1 + $0x10] ss:$8 sps:$4 sm:$0xff]  }
  0x18   :  { %97 = vmatprep.subr.bf16.mxu0 %v622_v2  ;;  %v628_v6 = vld [vmem:[%s848_s0] sm:$0xff]   ;;  %v631_v9 = vld [vmem:[#allocation3 + $0x48] sm:$0xff]   ;;  %v633_v11 = vld [vmem:[#allocation3 + $0x50] sm:$0xff]   ;;  %v709_v24 = vmov 0.0   ;;  %v807_v30 = vshrl.u32 %v58_v29, 7  ;;  %vm710_vm1 = vmmov 0  }
  0x19   :  { %98 = vmatpush1.bf16.msra.mxu0 %v624_v3  ;;  %v629_v7 = vld [vmem:[#allocation3 + $0x40] sm:$0xff]   ;;  %v632_v10 = vld [vmem:[#allocation3 + $0x8] sm:$0xff]   ;;  %v634_v12 = vld [vmem:[#allocation3 + $0x10] sm:$0xff]   ;;  %vm451_vm2 = vcmask 523264   ;;  %vm504_vm3 = vcmask 122880  }
  0x1a   :  { %99 = vmatprep.subr.bf16.mxu0 %v625_v4  ;;  %v630_v8 = vld [vmem:[#allocation3] sm:$0xff]   ;;  %555 = vmatprep.subr.bf16.mxu1 %v629_v7  ;;  %v635_v13 = vld [vmem:[#allocation3 + $0x58] sm:$0xff]   ;;  %v639_v17 = vld [vmem:[#allocation3 + $0x68] sm:$0xff]   ;;  %v60_v31 = vsub.s32 0, %v807_v30  ;;  %v64_v33 = vsub.s32 1, %v807_v30 }
  0x1b   :  { %556 = vmatpush3.bf16.msra.mxu1 %v630_v8  ;;  %v636_v14 = vld [vmem:[#allocation3 + $0x18] sm:$0xff]   ;;  %v637_v15 = vld [vmem:[#allocation3 + $0x60] sm:$0xff]   ;;  %v640_v18 = vld [vmem:[#allocation3 + $0x28] sm:$0xff]  }
  0x1c   :  { %557 = vmatprep.subr.bf16.mxu1 %v631_v9  ;;  %v638_v16 = vld [vmem:[#allocation3 + $0x20] sm:$0xff]   ;;  %v641_v19 = vld [vmem:[#allocation3 + $0x70] sm:$0xff]   ;;  %v643_v21 = vld [vmem:[#allocation3 + $0x78] sm:$0xff]  }
  0x1d   :  { %100 = vmatpush1.bf16.msra.mxu0 %v627_v5  ;;  %v642_v20 = vld [vmem:[#allocation3 + $0x30] sm:$0xff]   ;;  %v644_v22 = vld [vmem:[#allocation3 + $0x38] sm:$0xff]   ;;  %v646_v25 = vld [vmem:[%s853_s5 + $0x8] sm:$0xff]  }
  0x1e   :  { %v645_v23 = vld [vmem:[%s853_s5] sm:$0xff]   ;;  %588 = vmatprep.subr.bf16.mxu0 %v709_v24  ;;  %v647_v26 = vld [vmem:[%s853_s5 + $0x10] sm:$0xff]   ;;  %v648_v27 = vld [vmem:[%s853_s5 + $0x18] sm:$0xff]  }
  0x1f   :  { %558 = vmatpush3.bf16.msra.mxu1 %v632_v10  ;;  %v649_v28 = vld [vmem:[%s853_s5 + $0x20] sm:$0xff]   ;;  %v650_v50 = vld [vmem:[%s853_s5 + $0x28] sm:$0xff]   ;;  %v651_v51 = vld [vmem:[%s853_s5 + $0x30] sm:$0xff]  }
  0x20   :  { %526 = vmatmul.mubr.msk.bf16.vlgmr.msra.gmra.mrb[0].mxu0 %vm93_vm0, %v628_v6  ;;  %559 = vmatprep.subr.bf16.mxu1 %v633_v11  ;;  %v56_v32 = vld [vmem:[%s850_s2] sm:$0x3]  ;;  %v652_v52 = vld [vmem:[%s853_s5 + $0x38] sm:$0xff]  }
  0x21   :  { %589 = vmatpush3.bf16.msra.mxu0 %v645_v23  ;;  %v61_v34 = vrot.slane %v56_v32, %v60_v31  ;;  %v65_v35 = vrot.slane %v56_v32, %v64_v33  ;;  %604 = vmatprep.mubr.msk.bf16.mxu0 %vm710_vm1, %v709_v24  ;;  %v527_v54 = vld [vmem:[%s852_s4] ss:$0 sm:$0xff] }
  0x22   :  { %590 = vmatprep.subr.bf16.mxu0 %v709_v24  ;;  %v441_v1 = vld [vmem:[#allocation2] sm:$0x1] }
  0x23   :  { %560 = vmatpush3.bf16.msra.mxu1 %v634_v12  ;;  %444 = vperm.xlu0 %621, %v441_v1   ;;  %v544_v2 = vld [vmem:[%s854_s6] ss:$0 sm:$0xff]  ;;  %s711_s6 = smov [#allocation6]  }
  0x24   :  { %561 = vmatprep.subr.bf16.mxu1 %v635_v13  ;;  %v439_v13 = vld [vmem:[%s855_s7] sm:$0x1]  ;;  %s512_s3 = sshll.u32 %s711_s6, 4  ;;  %s513_s3 = int_to_ptr.vmem [resolvable:$true] %s512_s3 }
  0x25   :  { %591 = vmatpush3.bf16.msra.mxu0 %v646_v25  ;;  %s679_s7 = scalar_lea.vmem %s513_s3, 16  ;;  %s683_s30 = scalar_lea.vmem %s513_s3, 32 }
  0x26   :  { %592 = vmatprep.subr.bf16.mxu0 %v709_v24  ;;  %p680_p8 = scmp.ne.s32.totalorder %s513_s3, %s679_s7  ;;  %p684_p9 = scmp.lt.s32.totalorder %s513_s3, %s513_s3 }
  0x27   :  { %562 = vmatpush3.bf16.msra.mxu1 %v636_v14  ;;  %p685_p10 = scmp.lt.s32.totalorder %s683_s30, %s679_s7 }
  0x28   :  { %563 = vmatprep.subr.bf16.mxu1 %v637_v15 }
  0x29   :  { %593 = vmatpush3.bf16.msra.mxu0 %v647_v26  ;;  %p686_p11 = por %p685_p10, %p684_p9 }
  0x2a   :  { %594 = vmatprep.subr.bf16.mxu0 %v709_v24 }
  0x2b   :  { %564 = vmatpush3.bf16.msra.mxu1 %v638_v16  ;;  %p687_p12 = pnand %p686_p11, %p680_p8 }
  0x2c   :  { %565 = vmatprep.subr.bf16.mxu1 %v639_v17 }
  0x2d   :  { %595 = vmatpush3.bf16.msra.mxu0 %v648_v27 }
  0x2e   :  { %596 = vmatprep.subr.bf16.mxu0 %v709_v24 }
  0x2f   :  { %566 = vmatpush3.bf16.msra.mxu1 %v640_v18 }
  0x30   :  { %567 = vmatprep.subr.bf16.mxu1 %v641_v19 }
  0x31   :  { %597 = vmatpush3.bf16.msra.mxu0 %v649_v28 }
  0x32   :  { %598 = vmatprep.subr.bf16.mxu0 %v709_v24 }
  0x33   :  { %568 = vmatpush3.bf16.msra.mxu1 %v642_v20 }
  0x34   :  { %569 = vmatprep.subr.bf16.mxu1 %v643_v21 }
  0x35   :  { %599 = vmatpush3.bf16.msra.mxu0 %v650_v50 }
  0x36   :  { %600 = vmatprep.subr.bf16.mxu0 %v709_v24 }
  0x37   :  { %570 = vmatpush3.bf16.msra.mxu1 %v644_v22 }
  0x38   :  { %608 = vmatprep.subr.bf16.mxu1 %v709_v24 }
  0x39   :  { %601 = vmatpush3.bf16.msra.mxu0 %v651_v51 }
  0x3a   :  { %602 = vmatprep.subr.bf16.mxu0 %v709_v24 }
  0x3d   :  { %603 = vmatpush3.bf16.msra.mxu0 %v652_v52 }
  0xa2   :  { %v445_v14 = vpop.permute.xlu0 %444 }
  0xa3   :  { %v450_v15 = vrot.slane %v445_v14, %v60_v31 }
  0xf3   :  { %v131_v36 = vpop.f32.mrb[0].mxu0 }
  0xf4   :  { %v132_v37 = vadd.f32 %v131_v36, %v61_v34  ;;  %v133_v38 = vpop.f32.mrb[1].mxu0 }
  0xf5   :  { %v134_v39 = vadd.f32 %v133_v38, %v65_v35  ;;  %v135_v40 = vpop.f32.mrb[2].mxu0 }
  0xf6   :  { %v136_v41 = vadd.f32 %v135_v40, %v61_v34  ;;  %v137_v42 = vpop.f32.mrb[3].mxu0  ;;  %v140_v44 = vmax.f32 %v132_v37, 0.0 }
  0xf7   :  { %v138_v43 = vadd.f32 %v137_v42, %v65_v35  ;;  %v141_v46 = vmax.f32 %v134_v39, 0.0 }
  0xf8   :  { %v142_v45 = vmax.f32 %v136_v41, 0.0 }
  0xf9   :  { %v143_v47 = vmax.f32 %v138_v43, 0.0 }
  0xfa   :  { %v144_v48 = vpack.c.bf16 %v142_v45, %v140_v44 }
  0xfb   :  { %v145_v49 = vpack.c.bf16 %v143_v47, %v141_v46 }
  0xfd   :  { %313 = vmatprep.mubr.bf16.mxu1 %v145_v49 }
  0xfe   :  { %314 = vmatmul.mubr.bf16.vlgmr.msra.gmra.mrb[0].mxu1 %v144_v48 }
  0xff   :  { %610 = vmatprep.mubr.msk.bf16.mxu1 %vm710_vm1, %v709_v24 }
 0x1d1   :  { %v571_v53 = vpop.f32.mrb[0].mxu1 }
 0x1d2   :  { %v572_v55 = vpop.f32.mrb[1].mxu1 }
 0x1d3   :  { %v573_v56 = vadd.f32 %v572_v55, %v571_v53  ;;  %v574_v57 = vpop.f32.mrb[2].mxu1 }
 0x1d4   :  { %v575_v58 = vpop.f32.mrb[3].mxu1 }
 0x1d5   :  { %v316_v59 = vadd.f32 %v573_v56, %v527_v54  ;;  %v576_v60 = vadd.f32 %v575_v58, %v574_v57 }
 0x1d7   :  { %v319_v61 = vadd.f32 %v576_v60, %v527_v54  ;;  %v322_v62 = vmax.f32 %v316_v59, 0.0 }
 0x1d9   :  { %v323_v63 = vmax.f32 %v319_v61, 0.0 }
 0x1db   :  { %v324_v0 = vpack.c.bf16 %v323_v63, %v322_v62 }
 0x1dd   :  { %605 = vmatmul.mubr.bf16.vlgmr.msra.gmra.mrb[4].mxu0 %v324_v0 }
 0x2b0   :  { %v430_v3 = vpop.f32.mrb[4].mxu0 }
 0x2b1   :  { %v431_v4 = vadd.f32 %v544_v2, %v430_v3  ;;  %v606_v5 = vpop.f32.mrb[5].mxu0 }
 0x2b2   :  { %v433_v6 = vpop.f32.mrb[6].mxu0 }
 0x2b3   :  { %v434_v7 = vadd.f32 %v544_v2, %v433_v6  ;;  %v607_v8 = vpop.f32.mrb[7].mxu0  ;;  %v437_v9 = vmax.f32 %v431_v4, 0.0 }
 0x2b5   :  { %v438_v10 = vmax.f32 %v434_v7, 0.0 }
 0x2b7   :  { %v440_v11 = vpack.c.bf16 %v438_v10, %v437_v9 }
 0x2b9   :  { %v456_v12 = vsel %vm451_vm2, %v440_v11, 0 }
 0x2ba   :  { %609 = vmatpush3.bf16.xpose.msra.mxu1 %v456_v12 }
 0x2c1   :  { %611 = vmatmul.mubr.msk.bf16.vlgmr.msra.gmra.mrb[4].mxu1 %vm451_vm2, %v439_v13 }
 0x394   :  { %v492_v16 = vpop.f32.mrb[4].mxu1 }
 0x395   :  { %v493_v17 = vadd.f32 %v492_v16, %v450_v15  ;;  %v612_v18 = vpop.f32.mrb[5].mxu1 }
 0x396   :  { %v495_v19 = vpop.f32.mrb[6].mxu1 }
 0x397   :  { %v554_v20 = vmul.f32 -1.442695, %v493_v17  ;;  %v613_v21 = vpop.f32.mrb[7].mxu1 }
 0x399   :  { %653 = vpow2.f32 %v554_v20 }
 0x3a3   :  { %v654_v22 = vpop.eup %653 }
 0x3a4   :  { %v501_v23 = vadd.f32 1.0, %v654_v22 }
 0x3a6   :  { %655 = vrcp.f32 %v501_v23 }
 0x3b0   :  { %v656_v24 = vpop.eup %655 }
 0x3b1   :  { %505 = vst.msk [vmem:[#allocation6] sm:$0x1] %vm504_vm3, %v656_v24 }
 0x3b2   :  { %690 = shalt.err (!%p687_p12)
}
 0x3b3   :  { %s691_s0 = scalar_lea.hbm %s857_s9, 16 }
 0x3b4   :  { %p692_p13 = scmp.ne.s32.totalorder %s857_s9, %s691_s0  ;;  %p695_p0 = scmp.lt.u32.totalorder %s691_s0, %s857_s9 }
 0x3b6   :  { %p697_p1 = pnand %p695_p0, %p692_p13 }
 0x3b8   :  { %700 = shalt.err (!%p697_p1)
}
 0x3b9   :  { %515 = dma.vmem_to_hbm [thread:$0]  %s513_s3, 16, %s857_s9, [#allocation5]  }
 0x3ba   :  { %703 = dma.done.wait [#allocation5], 16  }
 0x3bb   :  { %704 = vsyncadd [#allocation5], 4294967280 }
 0x3bc   :  { %519 = vsyncpa [#allocation4], 1 }
 0x3bd   :  { %520 = vsyncpa [#allocation5], 1 }

</bundles_post_ra>
